<compile_context>
chip_gen: v7x
topology: tpu7x:2x2x1
jax: 0.10.0
libtpu: 0.0.40
codegen_flags: <defaults>
</compile_context>

<pallas_src>
import functools

import jax
import jax.numpy as jnp
from jax.experimental import pallas as pl
from jax.experimental.pallas import tpu as pltpu

BN_EPS = 1e-5  # nn.BatchNorm1d default
HALO = 16      # halo rows fetched from the next row-block (>= 10 needed, 16 = bf16 packing)


def _round_up(v, m):
    return ((v + m - 1) // m) * m


def conv_layer_kernel(xm_ref, xh_ref, w_ref, b_ref, o_ref, y_scr, *, tl, seq_len):
    # xm_ref: (1, 1, 2*tl, C) bf16  main input rows of tile j (padded row coords)
    # xh_ref: (1, 1, HALO, C) bf16  halo = first HALO rows of row-block j+1 (same array)
    # w_ref : (3*C, C)        bf16  stacked tap weights [W0; W1; W2], BN scale folded in
    # b_ref : (1, C)          f32   conv bias + BN shift folded
    # o_ref : (1, 1, tl, C)         pooled output rows of tile j
    # y_scr : (2*tl+8, C)     f32   conv + ELU rows for this tile
    j = pl.program_id(1)
    m = 2 * tl + 8                                    # conv rows computed (sublane aligned)

    xw = jnp.concatenate([xm_ref[0, 0], xh_ref[0, 0]], axis=0)        # (2*tl+HALO, C) bf16
    # im2col over the 3 taps: row r of `a` is [x[r] | x[r+1] | x[r+2]]  -> K = 3*C
    a = jnp.concatenate([xw[0:m], xw[1:m + 1], xw[2:m + 2]], axis=1)  # (m, 3*C) bf16

    y = jnp.dot(a, w_ref[...], preferred_element_type=jnp.float32)    # (m, C) f32, one MXU pass
    y = y + b_ref[...]                                                # conv bias + BN (folded)
    y = jnp.where(y > 0, y, jnp.exp(jnp.minimum(y, 0.0)) - 1.0)       # ELU (alpha = 1)
    y_scr[...] = y

    # Conv rows outside [0, L) must not win the max-pool (MaxPool1d's implicit -inf pad).
    # Only the first / last tile can contain such rows -> gate the masking work.
    @pl.when((j == 0) | (j == pl.num_programs(1) - 1))
    def _():
        r = jax.lax.broadcasted_iota(jnp.int32, (m, 1), 0)
        c = 2 * j * tl - 1 + r                        # global conv-row index of local row r
        valid = (c >= 0) & (c < seq_len)
        y_scr[...] = jnp.where(valid, y_scr[...], jnp.float32(-1e30))

    # MaxPool1d(k=3, s=2, p=1): pooled row q = max over local conv rows 2q, 2q+1, 2q+2.
    p0 = y_scr[pl.ds(0, tl, stride=2), :]
    p1 = y_scr[pl.ds(1, tl, stride=2), :]
    p2 = y_scr[pl.ds(2, tl, stride=2), :]
    o_ref[0, 0] = jnp.maximum(jnp.maximum(p0, p1), p2).astype(o_ref.dtype)


def conv_layer(x, conv_w, conv_b, bn_gamma, bn_beta, bn_mean, bn_var, *, tl=256):
    """ConvLayer forward.  x: (B, L, C); conv_w: (C_out, C_in, 3); rest: (C,)."""
    B, L, C = x.shape
    l_out = (L - 1) // 2 + 1                          # MaxPool1d(k=3, s=2, p=1) output length
    tl = max(8, min(_round_up(tl, 8), _round_up(l_out, 8)))   # pooled rows per tile
    nt = (l_out + tl - 1) // tl
    m = 2 * tl + 8                                    # conv rows computed per tile

    # ---- Fold BatchNorm (running stats) into the conv weight & bias (host-side) ----
    scale = bn_gamma / jnp.sqrt(bn_var + BN_EPS)                         # (C_out,)
    w_stk = jnp.transpose(conv_w, (2, 1, 0)) * scale[None, None, :]      # (3, C_in, C_out)
    w_stk = w_stk.reshape(3 * C, C).astype(jnp.bfloat16)                 # stacked taps, K=3C
    bias = ((conv_b - bn_mean) * scale + bn_beta).reshape(1, C).astype(jnp.float32)

    # ---- Circular pad (+2 left, +1 wrap right), bf16 cast, non-overlapping row blocks ----
    # Padded row i holds x[(i - 2) mod L] for every row the conv actually needs; the tail is
    # zero-filled (those rows only feed conv rows that are masked or never pooled).
    l_pad = (nt + 1) * 2 * tl
    x_bf = x.astype(jnp.bfloat16)
    x_pad = jnp.concatenate(
        [x_bf[:, L - 2:, :], x_bf, x_bf[:, :1, :],
         jnp.zeros((B, l_pad - (L + 3), C), jnp.bfloat16)], axis=1)
    x_pad = x_pad.reshape(B, nt + 1, 2 * tl, C)
    # TODO(synk): a fully in-kernel halo DMA (memory_space=pl.ANY + make_async_copy) would
    # also remove this pad/cast copy; kept as a single cheap concatenate for robustness.

    kernel = functools.partial(conv_layer_kernel, tl=tl, seq_len=L)
    out = pl.pallas_call(
        kernel,
        out_shape=jax.ShapeDtypeStruct((B, nt, tl, C), x.dtype),
        grid_spec=pltpu.PrefetchScalarGridSpec(
            num_scalar_prefetch=0,
            grid=(B, nt),
            in_specs=[
                # main 2*tl input rows of tile j  (padded rows [2*j*tl, 2*j*tl + 2*tl))
                pl.BlockSpec((1, 1, 2 * tl, C), lambda b, j: (b, j, 0, 0)),
                # HALO rows = first rows of block j+1 (second view of the same array)
                pl.BlockSpec((1, 1, HALO, C), lambda b, j: (b, j + 1, 0, 0)),
                pl.BlockSpec((3 * C, C), lambda b, j: (0, 0)),    # weights stay resident
                pl.BlockSpec((1, C), lambda b, j: (0, 0)),        # folded bias
            ],
            out_specs=pl.BlockSpec((1, 1, tl, C), lambda b, j: (b, j, 0, 0)),
            scratch_shapes=[pltpu.VMEM((m, C), jnp.float32)],
        ),
        compiler_params=pltpu.CompilerParams(
            dimension_semantics=("parallel", "parallel"),
        ),
    )(x_pad, x_pad, w_stk, bias)

    return out.reshape(B, nt * tl, C)[:, :l_out, :]


def conv_layer_ref(x, conv_w, conv_b, bn_gamma, bn_beta, bn_mean, bn_var):
    """Pure-JAX reference mirroring the PyTorch ops literally (fp32 throughout)."""
    xt = jnp.transpose(x, (0, 2, 1))                                    # (B, C, L)
    xp = jnp.concatenate([xt[:, :, -1:], xt, xt[:, :, :1]], axis=-1)    # circular pad 1
    y = jax.lax.conv_general_dilated(
        xp, conv_w, window_strides=(1,), padding="VALID",
        dimension_numbers=("NCH", "OIH", "NCH"))
    y = y + conv_b[None, :, None]
    y = (y - bn_mean[None, :, None]) * jax.lax.rsqrt(bn_var[None, :, None] + BN_EPS)
    y = y * bn_gamma[None, :, None] + bn_beta[None, :, None]
    y = jnp.where(y > 0, y, jnp.exp(jnp.minimum(y, 0.0)) - 1.0)         # ELU
    y = jax.lax.reduce_window(
        y, -jnp.inf, jax.lax.max,
        window_dimensions=(1, 1, 3), window_strides=(1, 1, 2),
        padding=((0, 0), (0, 0), (1, 1)))                               # MaxPool1d
    return jnp.transpose(y, (0, 2, 1))                                  # (B, L_out, C)


if __name__ == "__main__":
    # Small but lane-dense shapes: batch=2, seq=64, channels=128 (c_in of the module).
    B, L, C = 2, 64, 128

    key = jax.random.PRNGKey(0)
    kx, kw, kb, kg, kbe, km, kv = jax.random.split(key, 7)

    x = jax.random.normal(kx, (B, L, C), dtype=jnp.float32)
    conv_w = jax.random.normal(kw, (C, C, 3), dtype=jnp.float32) * 0.05   # (out, in, k)
    conv_b = jax.random.normal(kb, (C,), dtype=jnp.float32) * 0.05
    bn_gamma = 1.0 + 0.1 * jax.random.normal(kg, (C,), dtype=jnp.float32)
    bn_beta = 0.1 * jax.random.normal(kbe, (C,), dtype=jnp.float32)
    bn_mean = 0.1 * jax.random.normal(km, (C,), dtype=jnp.float32)
    bn_var = 1.0 + 0.1 * jax.random.uniform(kv, (C,), dtype=jnp.float32)

    ref = conv_layer_ref(x, conv_w, conv_b, bn_gamma, bn_beta, bn_mean, bn_var)
    l_out = (L - 1) // 2 + 1

    # Default (large-tile) configuration: the whole pooled sequence fits one tile here.
    out = conv_layer(x, conv_w, conv_b, bn_gamma, bn_beta, bn_mean, bn_var)
    out = jax.block_until_ready(out)
    assert out.shape == (B, l_out, C), out.shape
    # Kernel feeds the MXU bf16 (fp32 accumulate); reference is full fp32.
    assert jnp.allclose(out, ref, atol=5e-2, rtol=5e-2), "mismatch (single-tile config)"

    # Small tile -> multi-tile grid: exercises halo blocks and the edge-only masking path.
    out2 = conv_layer(x, conv_w, conv_b, bn_gamma, bn_beta, bn_mean, bn_var, tl=8)
    out2 = jax.block_until_ready(out2)
    assert out2.shape == (B, l_out, C), out2.shape
    assert jnp.allclose(out2, ref, atol=5e-2, rtol=5e-2), "mismatch (multi-tile config)"

    print("KERNEL_OK")
</pallas_src>

<mosaic_0001>
module attributes {stable_mosaic.version = 11 : i64} {
  func.func @conv_layer_kernel(%arg0: i32, %arg1: i32, %arg2: memref<1x1x64x128xbf16, #tpu.memory_space<vmem>>, %arg3: memref<1x1x16x128xbf16, #tpu.memory_space<vmem>>, %arg4: memref<384x128xbf16, #tpu.memory_space<vmem>>, %arg5: memref<1x128xf32, #tpu.memory_space<vmem>>, %arg6: memref<1x1x32x128xf32, #tpu.memory_space<vmem>>, %arg7: memref<72x128xf32, #tpu.memory_space<vmem>>) attributes {dimension_semantics = [#tpu.dimension_semantics<parallel>, #tpu.dimension_semantics<parallel>], iteration_bounds = array<i64: 2, 1>, scalar_prefetch = 0 : i64, scratch_operands = 1 : i64, tpu.core_type = #tpu.core_type<tc>, window_params = [{transform_indices = @transform_0, window_bounds = array<i64: 1, 1, 64, 128>}, {transform_indices = @transform_1, window_bounds = array<i64: 1, 1, 16, 128>}, {pipeline_mode = #tpu.pipeline_mode<synchronous>, transform_indices = @transform_2, window_bounds = array<i64: 384, 128>}, {pipeline_mode = #tpu.pipeline_mode<synchronous>, transform_indices = @transform_3, window_bounds = array<i64: 1, 128>}, {transform_indices = @transform_4, window_bounds = array<i64: 1, 1, 32, 128>}]} {
    %c0 = arith.constant 0 : index
    %c0_0 = arith.constant 0 : index
    %c0_1 = arith.constant 0 : index
    %c0_2 = arith.constant 0 : index
    %0 = vector.load %arg2[%c0, %c0_0, %c0_1, %c0_2] : memref<1x1x64x128xbf16, #tpu.memory_space<vmem>>, vector<1x1x64x128xbf16>
    %1 = vector.shape_cast %0 : vector<1x1x64x128xbf16> to vector<64x128xbf16>
    %c0_3 = arith.constant 0 : index
    %c0_4 = arith.constant 0 : index
    %c0_5 = arith.constant 0 : index
    %c0_6 = arith.constant 0 : index
    %2 = vector.load %arg3[%c0_3, %c0_4, %c0_5, %c0_6] : memref<1x1x16x128xbf16, #tpu.memory_space<vmem>>, vector<1x1x16x128xbf16>
    %3 = vector.shape_cast %2 : vector<1x1x16x128xbf16> to vector<16x128xbf16>
    %4 = tpu.concatenate %1, %3 in 0 : vector<64x128xbf16>, vector<16x128xbf16> -> vector<80x128xbf16>
    %5 = vector.extract_strided_slice %4 {offsets = [0, 0], sizes = [72, 128], strides = [1, 1]} : vector<80x128xbf16> to vector<72x128xbf16>
    %6 = vector.extract_strided_slice %4 {offsets = [1, 0], sizes = [72, 128], strides = [1, 1]} : vector<80x128xbf16> to vector<72x128xbf16>
    %7 = vector.extract_strided_slice %4 {offsets = [2, 0], sizes = [72, 128], strides = [1, 1]} : vector<80x128xbf16> to vector<72x128xbf16>
    %8 = tpu.concatenate %5, %6, %7 in 1 : vector<72x128xbf16>, vector<72x128xbf16>, vector<72x128xbf16> -> vector<72x384xbf16>
    %c0_7 = arith.constant 0 : index
    %c0_8 = arith.constant 0 : index
    %9 = vector.load %arg4[%c0_7, %c0_8] : memref<384x128xbf16, #tpu.memory_space<vmem>>, vector<384x128xbf16>
    %cst = arith.constant dense<0.000000e+00> : vector<72x128xf32>
    %10 = tpu.matmul %8, %9, %cst {dimension_numbers = #tpu.dot_dimension_numbers<[1], [0], [0], [1], [0, 0, 1, 1], [], []>} : vector<72x384xbf16>, vector<384x128xbf16>, vector<72x128xf32> -> vector<72x128xf32>
    %c0_9 = arith.constant 0 : index
    %c0_10 = arith.constant 0 : index
    %11 = vector.load %arg5[%c0_9, %c0_10] : memref<1x128xf32, #tpu.memory_space<vmem>>, vector<1x128xf32>
    %12 = vector.broadcast %11 : vector<1x128xf32> to vector<72x128xf32>
    %13 = arith.addf %10, %12 : vector<72x128xf32>
    %cst_11 = arith.constant 0.000000e+00 : f32
    %14 = vector.broadcast %cst_11 : f32 to vector<72x128xf32>
    %15 = arith.cmpf ogt, %13, %14 : vector<72x128xf32>
    %cst_12 = arith.constant 0.000000e+00 : f32
    %16 = vector.broadcast %cst_12 : f32 to vector<72x128xf32>
    %17 = arith.minimumf %13, %16 : vector<72x128xf32>
    %18 = math.exp %17 : vector<72x128xf32>
    %cst_13 = arith.constant 1.000000e+00 : f32
    %19 = vector.broadcast %cst_13 : f32 to vector<72x128xf32>
    %20 = arith.subf %18, %19 : vector<72x128xf32>
    %21 = arith.select %15, %13, %20 : vector<72x128xi1>, vector<72x128xf32>
    %c0_14 = arith.constant 0 : index
    %c0_15 = arith.constant 0 : index
    %22 = vector.load %arg7[%c0_14, %c0_15] : memref<72x128xf32, #tpu.memory_space<vmem>>, vector<72x128xf32>
    tpu.vector_store %arg7[%c0_14, %c0_15], %21 {strides = array<i32>} : memref<72x128xf32, #tpu.memory_space<vmem>>, vector<72x128xf32>,
    %c0_i32 = arith.constant 0 : i32
    %23 = arith.cmpi eq, %arg1, %c0_i32 : i32
    %c0_i32_16 = arith.constant 0 : i32
    %24 = arith.cmpi eq, %arg1, %c0_i32_16 : i32
    %25 = arith.ori %23, %24 : i1
    %26 = arith.extui %25 : i1 to i32
    %c0_i32_17 = arith.constant 0 : i32
    %27 = arith.cmpi ne, %26, %c0_i32_17 : i32
    scf.if %27 {
      %36 = tpu.iota {dimensions = array<i32: 0>} : vector<72x1xi32>
      %c2_i32 = arith.constant 2 : i32
      %37 = arith.muli %c2_i32, %arg1 : i32
      %c32_i32 = arith.constant 32 : i32
      %38 = arith.muli %37, %c32_i32 : i32
      %c1_i32 = arith.constant 1 : i32
      %39 = arith.subi %38, %c1_i32 : i32
      %40 = vector.broadcast %39 : i32 to vector<72x1xi32>
      %41 = arith.addi %40, %36 : vector<72x1xi32>
      %c0_i32_26 = arith.constant 0 : i32
      %42 = vector.broadcast %c0_i32_26 : i32 to vector<72x1xi32>
      %43 = arith.cmpi sge, %41, %42 : vector<72x1xi32>
      %c64_i32 = arith.constant 64 : i32
      %44 = vector.broadcast %c64_i32 : i32 to vector<72x1xi32>
      %45 = arith.cmpi slt, %41, %44 : vector<72x1xi32>
      %46 = arith.andi %43, %45 : vector<72x1xi1>
      %c0_27 = arith.constant 0 : index
      %c0_28 = arith.constant 0 : index
      %47 = vector.load %arg7[%c0_27, %c0_28] : memref<72x128xf32, #tpu.memory_space<vmem>>, vector<72x128xf32>
      %cst_29 = arith.constant -1.000000e+30 : f32
      %48 = vector.shape_cast %46 : vector<72x1xi1> to vector<72x1xi1>
      %49 = vector.broadcast %48 : vector<72x1xi1> to vector<72x128xi1>
      %50 = vector.broadcast %cst_29 : f32 to vector<72x128xf32>
      %51 = arith.select %49, %47, %50 : vector<72x128xi1>, vector<72x128xf32>
      %c0_30 = arith.constant 0 : index
      %c0_31 = arith.constant 0 : index
      %52 = vector.load %arg7[%c0_30, %c0_31] : memref<72x128xf32, #tpu.memory_space<vmem>>, vector<72x128xf32>
      tpu.vector_store %arg7[%c0_30, %c0_31], %51 {strides = array<i32>} : memref<72x128xf32, #tpu.memory_space<vmem>>, vector<72x128xf32>,
    } else {
    }
    %c0_18 = arith.constant 0 : index
    %c0_19 = arith.constant 0 : index
    %28 = tpu.strided_load %arg7[%c0_18, %c0_19] {strides = array<i32: 2, 1>} : memref<72x128xf32, #tpu.memory_space<vmem>>, vector<32x128xf32>
    %c1 = arith.constant 1 : index
    %c0_20 = arith.constant 0 : index
    %29 = tpu.strided_load %arg7[%c1, %c0_20] {strides = array<i32: 2, 1>} : memref<72x128xf32, #tpu.memory_space<vmem>>, vector<32x128xf32>
    %c2 = arith.constant 2 : index
    %c0_21 = arith.constant 0 : index
    %30 = tpu.strided_load %arg7[%c2, %c0_21] {strides = array<i32: 2, 1>} : memref<72x128xf32, #tpu.memory_space<vmem>>, vector<32x128xf32>
    %31 = arith.maximumf %28, %29 : vector<32x128xf32>
    %32 = arith.maximumf %31, %30 : vector<32x128xf32>
    %c0_22 = arith.constant 0 : index
    %c0_23 = arith.constant 0 : index
    %c0_24 = arith.constant 0 : index
    %c0_25 = arith.constant 0 : index
    %33 = vector.load %arg6[%c0_22, %c0_23, %c0_24, %c0_25] : memref<1x1x32x128xf32, #tpu.memory_space<vmem>>, vector<1x1x32x128xf32>
    %34 = vector.shape_cast %33 : vector<1x1x32x128xf32> to vector<32x128xf32>
    %35 = vector.shape_cast %32 : vector<32x128xf32> to vector<1x1x32x128xf32>
    tpu.vector_store %arg6[%c0_22, %c0_23, %c0_24, %c0_25], %35 {strides = array<i32>} : memref<1x1x32x128xf32, #tpu.memory_space<vmem>>, vector<1x1x32x128xf32>,
    return
  }
  func.func @transform_0(%arg0: i32, %arg1: i32) -> (i32, i32, i32, i32) {
    %c0_i32 = arith.constant 0 : i32
    %c0_i32_0 = arith.constant 0 : i32
    %c0_i32_1 = arith.constant 0 : i32
    return %arg0, %arg1, %c0_i32, %c0_i32_0 : i32, i32, i32, i32
  }
  func.func @transform_1(%arg0: i32, %arg1: i32) -> (i32, i32, i32, i32) {
    %c1_i32 = arith.constant 1 : i32
    %0 = arith.addi %arg1, %c1_i32 : i32
    %c0_i32 = arith.constant 0 : i32
    %c0_i32_0 = arith.constant 0 : i32
    %c0_i32_1 = arith.constant 0 : i32
    return %arg0, %0, %c0_i32, %c0_i32_0 : i32, i32, i32, i32
  }
  func.func @transform_2(%arg0: i32, %arg1: i32) -> (i32, i32) {
    %c0_i32 = arith.constant 0 : i32
    %c0_i32_0 = arith.constant 0 : i32
    %c0_i32_1 = arith.constant 0 : i32
    return %c0_i32, %c0_i32_0 : i32, i32
  }
  func.func @transform_3(%arg0: i32, %arg1: i32) -> (i32, i32) {
    %c0_i32 = arith.constant 0 : i32
    %c0_i32_0 = arith.constant 0 : i32
    %c0_i32_1 = arith.constant 0 : i32
    return %c0_i32, %c0_i32_0 : i32, i32
  }
  func.func @transform_4(%arg0: i32, %arg1: i32) -> (i32, i32, i32, i32) {
    %c0_i32 = arith.constant 0 : i32
    %c0_i32_0 = arith.constant 0 : i32
    %c0_i32_1 = arith.constant 0 : i32
    return %arg0, %arg1, %c0_i32, %c0_i32_0 : i32, i32, i32, i32
  }
}

</mosaic_0001>

<bundles_post_ra>
// kernel: tpu_custom_call.1
= control target key start
LH: loop header
LB: loop body
LE: loop exit
PB: predicated region body
PF: predicated region fallthrough
CT: control target
= control target key end

     0   :  { %s1932_s0 = inlined_call_operand.hbm [shape: bf16[2,2,64,128], index: 0, kind: input, shape index: {}]   ;;  %s1933_s1 = inlined_call_operand.hbm [shape: bf16[2,2,64,128], index: 1, kind: input, shape index: {}]   ;;  %s1934_s2 = inlined_call_operand.hbm [shape: bf16[384,128], index: 2, kind: input, shape index: {}]   ;;  %s1935_s3 = inlined_call_operand.vmem [shape: f32[1,128], index: 3, kind: input, shape index: {}]   ;;  %s1936_s4 = inlined_call_operand.hbm [shape: f32[2,1,32,128], index: 4, kind: output, shape index: {}]  }
   0x1   :  { %1946 = sst [smem:[#allocation16_spill]] %s1932_s0 }
   0x2   :  { %1947 = sst [smem:[#allocation17_spill]] %s1934_s2 }
   0x3   :  { %9 = vsyncpa [#allocation4], 0 }
   0x4   :  { %11 = vsyncpa [#allocation4 + $0x1], 0 }
   0x5   :  { %12 = vsyncpa [#allocation7], 0 }
   0x6   :  { %14 = vsyncpa [#allocation7 + $0x1], 0 }
   0x7   :  { %15 = vsyncpa [#allocation5], 0 }
   0x8   :  { %17 = vsyncpa [#allocation5 + $0x1], 0  ;;  %s1580_s15 = smov 0   ;;  %s1582_s16 = smov 0  }
   0x9   :  { %s1584_s17 = smov 0   ;;  %s1586_s18 = smov 0  }
   0xa   :  { %s1588_s19 = smov 0   ;;  %s1590_s20 = smov 0  }
   0xb LB: > { %1948 = sst [smem:[#allocation14_spill]] %s1539_s19  ;;  %s1611_s21 = sadd.s32 4294967295, %s1543_s20   ;;  %s1543_s20 = sphi %s1590_s20, %s23_s20   ;;  %s1539_s19 = sphi %s1588_s19, %s1969_s19   ;;  %s1535_s18 = sphi %s1586_s18, %s1968_s18   ;;  %s1531_s17 = sphi %s1584_s17, %s1972_s17   ;;  %s1527_s16 = sphi %s1582_s16, %s1971_s16   ;;  %s1523_s15 = sphi %s1580_s15, %s1970_s15  }
   0xc   : > { %s1076_s22 = sadd.s32 4294967294, %s1543_s20   ;;  %p57_p0 = scmp.ne.s32.totalorder %s1527_s16, %s1523_s15 }
   0xd   : > { %p1937_p1 = scmp.eq.s32.totalorder %s1611_s21, 0  ;;  %p161_p3 = scmp.eq.s32.totalorder %s1076_s22, 1 }
   0xe   : > { %p1077_p5 = scmp.ge.s32.totalorder %s1543_s20, 1  ;;  %p168_p7 = scmp.lt.s32.totalorder %s1543_s20, 3 }
   0xf   : > { %p1620_p4 = por %p1937_p1, %p57_p0  ;;  %p1625_p6 = por %p161_p3, %p57_p0 }
  0x10   : > { %p1630_p8 = pnand %p1077_p5, %p168_p7  ;;  %s1545_s26 = smov [#allocation8]  }
  0x11   : > { %s1949_s23 = scalar_select %p1620_p4, 1, 0 }
  0x12   : > { %s1950_s24 = scalar_select %p1625_p6, 1, 0 }
  0x13   : > { %s1951_s25 = scalar_select %p1630_p8, 1, 0 }
  0x14   : > { %s180_s27 = sshll.u32 %s1545_s26, 4  ;;  %p1243_p9 = pneg %p1630_p8  ;;  %s181_s27 = int_to_ptr.vmem [resolvable:$true] %s180_s27 }
  0x15   : > { %s35_s29 = sadd.s32 1, %s1539_s19  ;;  %s1953_s2 = sld [smem:[#allocation17_spill]] }
  0x16   : > { %p1639_p11 = pnand %p1243_p9, %p1937_p1 }
  0x18   : > { %p1366_p13 = pneg %p1639_p11 }
  0x1b   : > { %s1364_s6 = scalar_lea.hbm %s1953_s2, 3072 }
  0x1c   : > { %p1365_p12 = scmp.ne.s32.totalorder %s1953_s2, %s1364_s6  ;;  %p1371_p5 = scmp.lt.u32.totalorder %s1364_s6, %s1953_s2 }
  0x1e   : > { %p1367_p0 = pnand %p1366_p13, %p1365_p12 }
  0x20   : > { %p1368_p3 = pneg %p1367_p0 }
  0x22   : > { %p1373_p7 = pnand %p1371_p5, %p1368_p3 }
  0x24   : > { %1376 = shalt.err (!%p1373_p7)
}
  0x25   : > { %s1377_s11 = scalar_lea.vmem %s181_s27, 3072  ;;  %p1385_p2 = scmp.lt.s32.totalorder %s181_s27, %s181_s27 }
  0x26   : > { %p1378_p9 = scmp.ne.s32.totalorder %s181_s27, %s1377_s11  ;;  %p1386_p6 = scmp.lt.s32.totalorder %s1377_s11, %s1377_s11 }
  0x28   : > { %p1380_p10 = pnand %p1378_p9, %p1366_p13  ;;  %p1387_p4 = por %p1386_p6, %p1385_p2 }
  0x2a   : > { %p1381_p1 = pneg %p1380_p10 }
  0x2c   : > { %p1388_p8 = pnand %p1387_p4, %p1381_p1 }
  0x2e   : > { %1391 = shalt.err (!%p1388_p8)
}
  0x2f   : > { %s1940_s12 = smov 64   ;;  %s1942_s13 = smov 4  }
  0x30   : > { %1246 = dma.hbm_to_vmem [thread:$0]  (!%p1639_p11), %s1953_s2, 3072, %s181_s27, [#allocation7], %s1940_s12, %s1940_s12, %s1942_s13  }
  0x31   : > { %p37_p1 = scmp.ge.s32.totalorder %s35_s29, 2  ;;  %s44_s26 = sadd.s32 1, %s1531_s17 }
  0x32   : > { %p51_p2 = scmp.ne.s32.totalorder %s1531_s17, %s1527_s16  ;;  %p52_p4 = scmp.eq.s32.totalorder %s1543_s20, 0 }
  0x33   : > { %s1974_s29 = smov (%p37_p1, %s35_s29), 0  ;;  %p1956_p8 = scmp.eq.s32.totalorder %s1611_s21, 1 }
  0x34   : > { %1954 = sst [smem:[#allocation15_spill]] %s1974_s29  ;;  %p1669_p6 = por %p52_p4, %p51_p2 }
  0x35   : > { %p1675_p10 = por %p1956_p8, %p51_p2  ;;  %s39_s5 = ssub.s32 %s1539_s19, %s1974_s29 }
  0x36   : > { %p1259_p11 = scmp.lt.s32.totalorder %s1543_s20, 2  ;;  %p42_p12 = scmp.eq.s32.totalorder %s39_s5, 0 }
  0x37   : > { %s1683_s27 = sand.u32 1, %s1531_s17   ;;  %s1135_s8 = sshll.u32 %s1539_s19, 10 }
  0x38   : > { %s1080_s6 = sshll.u32 %s1683_s27, 5  ;;  %s1958_s0 = sld [smem:[#allocation16_spill]] }
  0x39   : > { %s1687_s7 = scalar_select %p42_p12, %s1531_s17, %s44_s26  }
  0x3a   : > { %s201_s14 = scalar_lea.vmem [#allocation3], %s1080_s6  ;;  %p1699_p13 = pnand %p1259_p11, %p1669_p6 }
  0x3b   : > { %s210_s22 = sshll.u32 %s201_s14, 4  ;;  %s1706_s9 = scalar_lea.hbm %s1933_s1, %s1135_s8  ;;  %s1695_s22 = int_to_ptr.vmem [resolvable:$true] %s210_s22 }
  0x3c   : > { %s220_s10 = sand.u32 1, %s1543_s20   ;;  %s198_s13 = scalar_lea.sflag [#allocation4], %s1683_s27 }
  0x3d   : > { %p1394_p3 = pneg %p1699_p13 }
  0x3e   : > { %s1693_s11 = scalar_lea.hbm %s1958_s0, %s1135_s8  ;;  %s1397_s14 = scalar_lea.hbm %s1958_s0, 2048 }
  0x3f   : > { %s1392_s2 = scalar_lea.hbm %s1693_s11, 512  ;;  %p1398_p9 = scmp.lt.u32.totalorder %s1693_s11, %s1958_s0 }
  0x40   : > { %p1393_p0 = scmp.ne.s32.totalorder %s1693_s11, %s1392_s2  ;;  %p1399_p1 = scmp.lt.u32.totalorder %s1397_s14, %s1392_s2 }
  0x41   : > { %p1401_p4 = scmp.lt.u32.totalorder %s1392_s2, %s1693_s11 }
  0x42   : > { %p1395_p5 = pnand %p1394_p3, %p1393_p0  ;;  %p1400_p2 = por %p1399_p1, %p1398_p9 }
  0x44   : > { %p1396_p7 = pneg %p1395_p5  ;;  %p1402_p6 = por %p1401_p4, %p1400_p2 }
  0x46   : > { %p1403_p8 = pnand %p1402_p6, %p1396_p7 }
  0x48   : > { %1406 = shalt.err (!%p1403_p8)
}
  0x49   : > { %s1407_s8 = scalar_lea.vmem %s1695_s22, 512  ;;  %s1548_s26 = smov [#allocation3]  }
  0x4a   : > { %p1408_p11 = scmp.ne.s32.totalorder %s1695_s22, %s1407_s8  ;;  %s1412_s30 = sshll.u32 %s1548_s26, 4  ;;  %s1413_s30 = int_to_ptr.vmem [resolvable:$false] %s1412_s30 }
  0x4b   : > { %s1414_s29 = scalar_lea.vmem %s1413_s30, 1024  ;;  %p1415_p5 = scmp.lt.s32.totalorder %s1695_s22, %s1413_s30 }
  0x4c   : > { %p1410_p12 = pnand %p1408_p11, %p1394_p3  ;;  %p1416_p9 = scmp.lt.s32.totalorder %s1414_s29, %s1407_s8 }
  0x4e   : > { %p1411_p0 = pneg %p1410_p12  ;;  %p1417_p1 = por %p1416_p9, %p1415_p5 }
  0x50   : > { %p1418_p2 = pnand %p1417_p1, %p1411_p0 }
  0x52   : > { %1421 = shalt.err (!%p1418_p2)
}
  0x53   : > { %s1960_s2 = smov 4   ;;  %s1961_s6 = smov 64  }
  0x54   : > { %1250 = dma.hbm_to_vmem [thread:$0]  (!%p1699_p13), %s1693_s11, 512, %s1695_s22, %s198_s13, %s1961_s6, %s1961_s6, %s1960_s2  }
  0x55   : > { %s1741_s14 = scalar_lea.hbm %s1706_s9, 512  ;;  %s1083_s12 = sshll.u32 %s1683_s27, 3 }
  0x56   : > { %s224_s8 = scalar_lea.vmem [#allocation6], %s1083_s12  ;;  %s1748_s30 = scalar_lea.sflag [#allocation7], %s220_s10 }
  0x57   : > { %s234_s26 = sshll.u32 %s224_s8, 4  ;;  %s1452_s29 = scalar_lea.hbm %s1706_s9, 640  ;;  %s1744_s26 = int_to_ptr.vmem [resolvable:$true] %s234_s26 }
  0x58   : > { %p1423_p7 = scmp.ne.s32.totalorder %s1741_s14, %s1452_s29  ;;  %s1427_s22 = scalar_lea.hbm %s1933_s1, 2048 }
  0x59   : > { %p1428_p8 = scmp.lt.u32.totalorder %s1741_s14, %s1933_s1  ;;  %p1429_p11 = scmp.lt.u32.totalorder %s1427_s22, %s1452_s29 }
  0x5a   : > { %p1425_p4 = pnand %p1423_p7, %p1394_p3  ;;  %p1431_p0 = scmp.lt.u32.totalorder %s1452_s29, %s1741_s14 }
  0x5b   : > { %p1430_p12 = por %p1429_p11, %p1428_p8 }
  0x5c   : > { %p1426_p6 = pneg %p1425_p4 }
  0x5d   : > { %p1432_p5 = por %p1431_p0, %p1430_p12 }
  0x5f   : > { %p1433_p9 = pnand %p1432_p5, %p1426_p6 }
  0x61   : > { %1436 = shalt.err (!%p1433_p9)
}
  0x62   : > { %s1437_s27 = scalar_lea.vmem %s1744_s26, 128  ;;  %s1549_s9 = smov [#allocation6]  }
  0x63   : > { %p1438_p1 = scmp.ne.s32.totalorder %s1744_s26, %s1437_s27  ;;  %s1442_s10 = sshll.u32 %s1549_s9, 4  ;;  %s1443_s10 = int_to_ptr.vmem [resolvable:$false] %s1442_s10 }
  0x64   : > { %s1444_s0 = scalar_lea.vmem %s1443_s10, 256  ;;  %p1445_p4 = scmp.lt.s32.totalorder %s1744_s26, %s1443_s10 }
  0x65   : > { %p1440_p2 = pnand %p1438_p1, %p1394_p3  ;;  %p1446_p8 = scmp.lt.s32.totalorder %s1444_s0, %s1437_s27 }
  0x67   : > { %p1441_p7 = pneg %p1440_p2  ;;  %p1447_p11 = por %p1446_p8, %p1445_p4 }
  0x69   : > { %p1448_p12 = pnand %p1447_p11, %p1441_p7 }
  0x6b   : > { %1451 = shalt.err (!%p1448_p12)
}
  0x6c   : > { %1253 = dma.hbm_to_vmem [thread:$0]  (!%p1699_p13), %s1741_s14, 128, %s1744_s26, %s1748_s30, %s1961_s6, %s1961_s6, %s1960_s2  }
  0x6d   : > { %p1962_p3 = scmp.ne.s32.totalorder %s1951_s25, 0 }
  0x6e   : > { %s1780_s19 = sand.u32 (!%p1962_p3), 1, %s1527_s16   ;;  %p1963_p6 = scmp.ne.s32.totalorder (!%p1962_p3), %s1949_s23, 0 }
  0x6f   : > { %246 = sbr.rel (%p1962_p3) target bundleno = 454 (0x1c6), region = 36  ;;  %s1087_s12 = sshll.u32 (!%p1962_p3), %s1780_s19, 5 }
  0x70   : > { %s249_s8 = scalar_lea.sflag (!%p1962_p3), [#allocation4], %s1780_s19  ;;  %s1786_s5 = scalar_lea.vmem (!%p1962_p3), [#allocation3], %s1087_s12 }
  0x76   : > { %1506 = dma.done.wait (%p1963_p6), %s249_s8, 512  }
  0x77   : > { %1508 = vsyncadd (%p1963_p6), %s249_s8, 4294966784  ;;  %s257_s25 = sand.u32 1, %s1611_s21   ;;  %s1088_s2 = sshll.u32 %s1780_s19, 3 }
  0x78   : > { %s258_s6 = scalar_lea.sflag [#allocation7], %s257_s25  ;;  %s1794_s14 = scalar_lea.vmem [#allocation6], %s1088_s2 }
  0x79   : > { %1510 = dma.done.wait (%p1963_p6), %s258_s6, 128  }
  0x7a   : > { %1512 = vsyncadd (%p1963_p6), %s258_s6, 4294967168  ;;  %p1964_p13 = scmp.eq.s32.totalorder %s1611_s21, 0 }
  0x7c   : > { %1514 = dma.done.wait (%p1964_p13), [#allocation7], 3072   ;;  %p1965_p0 = pmov %p1964_p13 }
  0x7d   : > { %v1550_v0 = vmov 0.0   ;;  %vm1551_vm0 = vmmov 0   ;;  %v1317_v1 = vld [vmem:[#allocation8 + $0x40] sm:$0xff]   ;;  %v1320_v4 = vld [vmem:[#allocation8 + $0x48] sm:$0xff]   ;;  %v1323_v7 = vld [vmem:[#allocation8 + $0x50] sm:$0xff]   ;;  %vm382_vm2 = vcmask 1046528  }
  0x7e   : > { %1516 = vsyncadd (%p1965_p0), [#allocation7], 4294964224  ;;  %1197 = vmatprep.subr.bf16.mxu1 %v1550_v0  ;;  %1213 = vmatprep.mubr.msk.bf16.mxu1 %vm1551_vm0, %v1550_v0  ;;  %v1318_v2 = vld [vmem:[#allocation8] sm:$0xff]   ;;  %v1321_v5 = vld [vmem:[#allocation8 + $0x8] sm:$0xff]   ;;  %vm337_vm1 = vsmask.f32 7424 }
  0x7f   : > { %1138 = vmatprep.subr.bf16.mxu0 %v1317_v1  ;;  %v1319_v3 = vld [vmem:[#allocation8 + $0x80] sm:$0xff]   ;;  %v1322_v6 = vld [vmem:[#allocation8 + $0x88] sm:$0xff]   ;;  %v1324_v8 = vld [vmem:[#allocation8 + $0x10] sm:$0xff]   ;;  %s1869_s26 = scalar_lea.vmem [#allocation9], %s1087_s12  ;;  %s1137_s30 = sshll.u32 %s1535_s18, 9 }
  0x80   : > { %1139 = vmatpush3.bf16.msra.mxu0 %v1318_v2  ;;  %1198 = vmatpush3.bf16.msra.mxu1 %v1319_v3  ;;  %v1325_v9 = vld [vmem:[#allocation8 + $0x90] sm:$0xff]   ;;  %v1326_v10 = vld [vmem:[#allocation8 + $0x58] sm:$0xff]   ;;  %v1329_v13 = vld [vmem:[#allocation8 + $0x60] sm:$0xff]   ;;  %s952_s29 = sshll.u32 %s1869_s26, 4  ;;  %s1880_s22 = scalar_lea.hbm %s1936_s4, %s1137_s30  ;;  %s1882_s29 = int_to_ptr.vmem [resolvable:$true] %s952_s29 }
  0x81   : > { %1140 = vmatprep.subr.bf16.mxu0 %v1320_v4  ;;  %1199 = vmatprep.subr.bf16.mxu1 %v1550_v0  ;;  %v1327_v11 = vld [vmem:[#allocation8 + $0x18] sm:$0xff]   ;;  %v1330_v14 = vld [vmem:[#allocation8 + $0x20] sm:$0xff]   ;;  %v1332_v16 = vld [vmem:[#allocation8 + $0x68] sm:$0xff]   ;;  %s937_s27 = scalar_lea.sflag [#allocation5], %s1780_s19  ;;  %s1453_s9 = scalar_lea.vmem %s1882_s29, 512 }
  0x82   : > { %v1328_v12 = vld [vmem:[#allocation8 + $0x98] sm:$0xff]   ;;  %v1331_v15 = vld [vmem:[#allocation8 + $0xa0] sm:$0xff]   ;;  %v1333_v17 = vld [vmem:[#allocation8 + $0x28] sm:$0xff]   ;;  %p1454_p5 = scmp.ne.s32.totalorder %s1882_s29, %s1453_s9  ;;  %s1552_s18 = smov [#allocation9]  }
  0x83   : > { %v1334_v18 = vld [vmem:[#allocation8 + $0xa8] sm:$0xff]   ;;  %v1335_v19 = vld [vmem:[#allocation8 + $0x70] sm:$0xff]   ;;  %v1338_v22 = vld [vmem:[#allocation8 + $0x78] sm:$0xff]   ;;  %s1457_s10 = sshll.u32 %s1552_s18, 4  ;;  %s1458_s10 = int_to_ptr.vmem [resolvable:$false] %s1457_s10 }
  0x84   : > { %1141 = vmatpush3.bf16.msra.mxu0 %v1321_v5  ;;  %1200 = vmatpush3.bf16.msra.mxu1 %v1322_v6  ;;  %v1336_v20 = vld [vmem:[#allocation8 + $0x30] sm:$0xff]   ;;  %v1341_v24 = vld [vmem:[%s1786_s5 + $0x8] sm:$0xff]   ;;  %v1343_v32 = vld [vmem:[%s1786_s5 + $0x10] sm:$0xff]   ;;  %p1455_p9 = pnand %p1454_p5, %p1675_p10  ;;  %s1459_s0 = scalar_lea.vmem %s1458_s10, 1024 }
  0x85   : > { %1142 = vmatprep.subr.bf16.mxu0 %v1323_v7  ;;  %1201 = vmatprep.subr.bf16.mxu1 %v1550_v0  ;;  %v1337_v21 = vld [vmem:[#allocation8 + $0xb0] sm:$0xff]   ;;  %v1339_v25 = vld [vmem:[#allocation8 + $0x38] sm:$0xff]   ;;  %v346_v28 = vshll.u32 %v1341_v24, 16  ;;  %v384_v31 = vrot.slane %v1341_v24, 1  ;;  %v350_v33 = vshrl.u32 %v1341_v24, 16  ;;  %v1344_v34 = vld [vmem:[%s1786_s5 + $0x18] sm:$0xff]   ;;  %p1460_p2 = scmp.lt.s32.totalorder %s1882_s29, %s1458_s10  ;;  %p1461_p7 = scmp.lt.s32.totalorder %s1459_s0, %s1453_s9 }
  0x86   : > { %v1340_v23 = vld [vmem:[%s1786_s5] sm:$0xff]   ;;  %v1342_v29 = vld [vmem:[#allocation8 + $0xb8] sm:$0xff]   ;;  %v354_v37 = vshll.u32 %v1343_v32, 16  ;;  %v358_v43 = vshrl.u32 %v1343_v32, 16  ;;  %v362_v44 = vshll.u32 %v1344_v34, 16  ;;  %v386_v46 = vrot.slane %v1343_v32, 1  ;;  %p1456_p1 = pneg %p1455_p9 }
  0x87   : > { %v339_v26 = vshrl.u32 %v1340_v23, 16  ;;  %v341_v27 = vshll.u32 %v1340_v23, 16  ;;  %v383_v30 = vrot.slane %v1340_v23, 1  ;;  %v348_v36 = vrot.slane %v346_v28, 1  ;;  %v1345_v49 = vld [vmem:[%s1794_s14] sm:$0xff]   ;;  %p1462_p4 = por %p1461_p7, %p1460_p2 }
  0x88   : > { %1143 = vmatpush3.bf16.msra.mxu0 %v1324_v8  ;;  %1202 = vmatpush3.bf16.msra.mxu1 %v1325_v9  ;;  %v356_v40 = vrot.slane %v354_v37, 1  ;;  %v364_v48 = vrot.slane %v362_v44, 1  ;;  %v387_v50 = vsel %vm382_vm2, %v384_v31, %v386_v46  ;;  %v366_v52 = vshrl.u32 %v1344_v34, 16  ;;  %v1838_v2 = vld [vmem:[%s1935_s3] ss:$0 sm:$0xff] }
  0x89   : > { %1144 = vmatprep.subr.bf16.mxu0 %v1326_v10  ;;  %1203 = vmatprep.subr.bf16.mxu1 %v1550_v0  ;;  %v343_v35 = vrot.slane %v341_v27, 1  ;;  %v352_v39 = vor.u32 %v350_v33, %v348_v36  ;;  %v385_v42 = vsel %vm382_vm2, %v383_v30, %v384_v31  ;;  %v370_v53 = vshll.u32 %v1345_v49, 16  ;;  %p1463_p8 = pnand %p1462_p4, %p1456_p1 }
  0x8a   : > { %v360_v47 = vor.u32 %v358_v43, %v356_v40  ;;  %v388_v54 = vrot.slane %v1344_v34, 1  ;;  %v368_v55 = vor.u32 %v366_v52, %v364_v48  ;;  %v374_v59 = vshrl.u32 %v1345_v49, 16 }
  0x8b   : > { %v344_v38 = vor.u32 %v343_v35, %v339_v26  ;;  %v357_v45 = vsel %vm337_vm1, %v352_v39, %v356_v40  ;;  %v372_v56 = vrot.slane %v370_v53, 1  ;;  %v390_v60 = vrot.slane %v1345_v49, 1 }
  0x8c   : > { %1145 = vmatpush3.bf16.msra.mxu0 %v1327_v11  ;;  %1204 = vmatpush3.bf16.msra.mxu1 %v1328_v12  ;;  %v365_v51 = vsel %vm337_vm1, %v360_v47, %v364_v48  ;;  %v389_v57 = vsel %vm382_vm2, %v386_v46, %v388_v54 }
  0x8d   : > { %1146 = vmatprep.subr.bf16.mxu0 %v1329_v13  ;;  %1205 = vmatprep.subr.bf16.mxu1 %v1550_v0  ;;  %v349_v41 = vsel %vm337_vm1, %v344_v38, %v348_v36  ;;  %v373_v58 = vsel %vm337_vm1, %v368_v55, %v372_v56  ;;  %v376_v61 = vor.u32 %v374_v59, %v372_v56 }
  0x8e   : > { %628 = vmatprep.mubr.bf16.mxu0 %v349_v41  ;;  %v391_v62 = vsel %vm382_vm2, %v388_v54, %v390_v60 }
  0x90   : > { %1147 = vmatpush3.bf16.msra.mxu0 %v1330_v14  ;;  %1206 = vmatpush3.bf16.msra.mxu1 %v1331_v15 }
  0x91   : > { %1148 = vmatprep.subr.bf16.mxu0 %v1332_v16  ;;  %1207 = vmatprep.subr.bf16.mxu1 %v1550_v0 }
  0x94   : > { %1149 = vmatpush3.bf16.msra.mxu0 %v1333_v17  ;;  %1208 = vmatpush3.bf16.msra.mxu1 %v1334_v18 }
  0x95   : > { %1150 = vmatprep.subr.bf16.mxu0 %v1335_v19  ;;  %1209 = vmatprep.subr.bf16.mxu1 %v1550_v0 }
  0x98   : > { %1151 = vmatpush3.bf16.msra.mxu0 %v1336_v20  ;;  %1210 = vmatpush3.bf16.msra.mxu1 %v1337_v21 }
  0x99   : > { %1152 = vmatprep.subr.bf16.mxu0 %v1338_v22  ;;  %1211 = vmatprep.subr.bf16.mxu1 %v1550_v0 }
  0x9c   : > { %1153 = vmatpush3.bf16.msra.mxu0 %v1339_v25  ;;  %1212 = vmatpush3.bf16.msra.mxu1 %v1342_v29 }
  0x9f   : > { %629 = vmatmul.mubr.bf16.vlgmr.msra.gmra.mrb[0].mxu0 %v1340_v23  ;;  %1214 = vmatmul.mubr.bf16.vlgmr.msra.gmra.mrb[0].mxu1 %v385_v42  ;;  %v807_v23 = vlaneseq }
  0xa0   : > { %636 = vmatprep.mubr.bf16.mxu0 %v357_v45  ;;  %1217 = vmatprep.mubr.msk.bf16.mxu1 %vm1551_vm0, %v1550_v0 }
  0xa7   : > { %637 = vmatmul.mubr.bf16.gmra.mrb[4].mxu0 %v1341_v24  ;;  %1218 = vmatmul.mubr.bf16.gmra.mrb[4].mxu1 %v387_v50 }
  0xa8   : > { %644 = vmatprep.mubr.bf16.mxu0 %v365_v51  ;;  %1221 = vmatprep.mubr.msk.bf16.mxu1 %vm1551_vm0, %v1550_v0 }
  0xaf   : > { %645 = vmatmul.mubr.bf16.gmra.mrb[8].mxu0 %v1343_v32  ;;  %1222 = vmatmul.mubr.bf16.gmra.mrb[8].mxu1 %v389_v57  ;;  %v1844_v32 = vshrl.u32 %v807_v23, 7 }
  0xb0   : > { %652 = vmatprep.mubr.bf16.mxu0 %v373_v58  ;;  %1225 = vmatprep.mubr.msk.bf16.mxu1 %vm1551_vm0, %v1550_v0 }
  0xb1   : > { %v820_v43 = vadd.s32 4294967295, %v1844_v32 }
  0xb3   : > { %vm829_vm3 = vcmp.ge.s32.totalorder %v820_v43, 0 }
  0xb7   : > { %653 = vmatmul.mubr.bf16.gmra.mrb[12].mxu0 %v1344_v34  ;;  %1226 = vmatmul.mubr.bf16.gmra.mrb[12].mxu1 %v391_v62 }
  0xb8   : > { %660 = vmatprep.mubr.bf16.mxu0 %v376_v61  ;;  %1229 = vmatprep.mubr.msk.bf16.mxu1 %vm1551_vm0, %v1550_v0 }
  0xbf   : > { %661 = vmatmul.mubr.bf16.gmra.mrb[16].mxu0 %v1345_v49  ;;  %1230 = vmatmul.mubr.bf16.gmra.mrb[16].mxu1 %v390_v60 }
 0x172   : > { %v1154_v63 = vpop.f32.mrb[0].mxu0  ;;  %v702_v3 = vpop.f32.mrb[0].mxu1 }
 0x173   : > { %v1155_v1 = vpop.f32.mrb[1].mxu0  ;;  %v1215_v6 = vpop.f32.mrb[1].mxu1 }
 0x174   : > { %v1156_v4 = vadd.f32 %v1155_v1, %v1154_v63  ;;  %v1157_v5 = vpop.f32.mrb[2].mxu0  ;;  %v705_v8 = vpop.f32.mrb[2].mxu1 }
 0x175   : > { %v1158_v7 = vpop.f32.mrb[3].mxu0  ;;  %v1216_v11 = vpop.f32.mrb[3].mxu1 }
 0x176   : > { %v631_v9 = vadd.f32 %v1156_v4, %v1838_v2  ;;  %v1159_v10 = vadd.f32 %v1158_v7, %v1157_v5 }
 0x178   : > { %v703_v0 = vadd.f32 %v702_v3, %v631_v9  ;;  %v634_v12 = vadd.f32 %v1159_v10, %v1838_v2 }
 0x17a   : > { %v749_v13 = vmin.f32 %v703_v0, 0.0  ;;  %v706_v14 = vadd.f32 %v705_v8, %v634_v12  ;;  %v1160_v15 = vpop.f32.mrb[4].mxu0  ;;  %v710_v17 = vpop.f32.mrb[4].mxu1  ;;  %vm740_vm4 = vcmp.gt.f32.partialorder %v703_v0, 0.0 }
 0x17b   : > { %v1161_v16 = vpop.f32.mrb[5].mxu0  ;;  %v1219_v22 = vpop.f32.mrb[5].mxu1 }
 0x17c   : > { %v758_v18 = vmul.f32 1.442695, %v749_v13  ;;  %v750_v19 = vmin.f32 %v706_v14, 0.0  ;;  %v1162_v20 = vadd.f32 %v1161_v16, %v1160_v15  ;;  %v1163_v21 = vpop.f32.mrb[6].mxu0  ;;  %v713_v25 = vpop.f32.mrb[6].mxu1  ;;  %vm741_vm5 = vcmp.gt.f32.partialorder %v706_v14, 0.0 }
 0x17d   : > { %v1164_v24 = vpop.f32.mrb[7].mxu0  ;;  %v1220_v29 = vpop.f32.mrb[7].mxu1 }
 0x17e   : > { %1346 = vpow2.f32 %v758_v18  ;;  %v760_v26 = vmul.f32 1.442695, %v750_v19  ;;  %v639_v27 = vadd.f32 %v1162_v20, %v1838_v2  ;;  %v1165_v28 = vadd.f32 %v1164_v24, %v1163_v21 }
 0x180   : > { %1348 = vpow2.f32 %v760_v26  ;;  %v711_v30 = vadd.f32 %v710_v17, %v639_v27  ;;  %v642_v31 = vadd.f32 %v1165_v28, %v1838_v2 }
 0x182   : > { %v751_v33 = vmin.f32 %v711_v30, 0.0  ;;  %v1846_v34 = vadd.f32 %v713_v25, %v642_v31  ;;  %v1166_v35 = vpop.f32.mrb[8].mxu0  ;;  %v718_v37 = vpop.f32.mrb[8].mxu1  ;;  %vm742_vm6 = vcmp.gt.f32.partialorder %v711_v30, 0.0 }
 0x183   : > { %v1167_v36 = vpop.f32.mrb[9].mxu0  ;;  %v1223_v42 = vpop.f32.mrb[9].mxu1 }
 0x184   : > { %v762_v38 = vmul.f32 1.442695, %v751_v33  ;;  %v752_v39 = vmin.f32 %v1846_v34, 0.0  ;;  %v1168_v40 = vadd.f32 %v1167_v36, %v1166_v35  ;;  %v1169_v41 = vpop.f32.mrb[10].mxu0  ;;  %v721_v45 = vpop.f32.mrb[10].mxu1  ;;  %vm743_vm7 = vcmp.gt.f32.partialorder %v1846_v34, 0.0 }
 0x185   : > { %v1170_v44 = vpop.f32.mrb[11].mxu0  ;;  %v1224_v49 = vpop.f32.mrb[11].mxu1 }
 0x186   : > { %1350 = vpow2.f32 %v762_v38  ;;  %v764_v46 = vmul.f32 1.442695, %v752_v39  ;;  %v647_v47 = vadd.f32 %v1168_v40, %v1838_v2  ;;  %v1171_v48 = vadd.f32 %v1170_v44, %v1169_v41 }
 0x188   : > { %v1347_v50 = vpop.eup %1346  ;;  %1352 = vpow2.f32 %v764_v46  ;;  %v1851_v51 = vadd.f32 %v718_v37, %v647_v47  ;;  %v650_v52 = vadd.f32 %v1171_v48, %v1838_v2 }
 0x189   : > { %v1121_v53 = vadd.f32 -1.0, %v1347_v50 }
 0x18a   : > { %v1349_v54 = vpop.eup %1348  ;;  %v753_v55 = vmin.f32 %v1851_v51, 0.0  ;;  %v1855_v56 = vadd.f32 %v721_v45, %v650_v52  ;;  %v1172_v57 = vpop.f32.mrb[12].mxu0  ;;  %vm744_vm8 = vcmp.gt.f32.partialorder %v1851_v51, 0.0  ;;  %v816_v52 = vadd.s32 64, %v1844_v32 }
 0x18b   : > { %v785_v58 = vsel %vm740_vm4, %v703_v0, %v1121_v53  ;;  %v1122_v59 = vadd.f32 -1.0, %v1349_v54  ;;  %v1173_v60 = vpop.f32.mrb[13].mxu0  ;;  %v726_v61 = vpop.f32.mrb[12].mxu1 }
 0x18c   : > { %v883_v62 = vsel %vm829_vm3, %v785_v58, -1e+30  ;;  %v766_v63 = vmul.f32 1.442695, %v753_v55  ;;  %v754_v1 = vmin.f32 %v1855_v56, 0.0  ;;  %v1174_v4 = vadd.f32 %v1173_v60, %v1172_v57  ;;  %v1175_v5 = vpop.f32.mrb[14].mxu0 }
 0x18d   : > { %892 = vst [vmem:[#allocation2] sm:$0xff] %v883_v62  ;;  %v786_v3 = vsel %vm741_vm5, %v706_v14, %v1122_v59  ;;  %v1227_v6 = vpop.f32.mrb[13].mxu1  ;;  %v1176_v8 = vpop.f32.mrb[15].mxu0  ;;  %vm745_vm9 = vcmp.gt.f32.partialorder %v1855_v56, 0.0  ;;  %v828_v60 = vadd.s32 4294967295, %v816_v52 }
 0x18e   : > { %893 = vst [vmem:[#allocation2 + $0x8] sm:$0xff] %v786_v3  ;;  %1354 = vpow2.f32 %v766_v63  ;;  %v768_v7 = vmul.f32 1.442695, %v754_v1  ;;  %v729_v9 = vpop.f32.mrb[14].mxu1  ;;  %v655_v10 = vadd.f32 %v1174_v4, %v1838_v2  ;;  %v1177_v11 = vadd.f32 %v1176_v8, %v1175_v5 }
 0x18f   : > { %v1228_v0 = vpop.f32.mrb[15].mxu1  ;;  %vm846_vm12 = vcmp.lt.s32.totalorder %v828_v60, 64 }
 0x190   : > { %v1351_v12 = vpop.eup %1350  ;;  %1356 = vpow2.f32 %v768_v7  ;;  %v727_v15 = vadd.f32 %v726_v61, %v655_v10  ;;  %v658_v16 = vadd.f32 %v1177_v11, %v1838_v2 }
 0x191   : > { %v1123_v13 = vadd.f32 -1.0, %v1351_v12 }
 0x192   : > { %v1353_v17 = vpop.eup %1352  ;;  %v1178_v14 = vpop.f32.mrb[16].mxu0  ;;  %v755_v20 = vmin.f32 %v727_v15, 0.0  ;;  %v730_v23 = vadd.f32 %v729_v9, %v658_v16  ;;  %vm746_vm10 = vcmp.gt.f32.partialorder %v727_v15, 0.0 }
 0x193   : > { %v787_v18 = vsel %vm742_vm6, %v711_v30, %v1123_v13  ;;  %v1124_v19 = vadd.f32 -1.0, %v1353_v17  ;;  %v1179_v21 = vpop.f32.mrb[17].mxu0  ;;  %v734_v22 = vpop.f32.mrb[16].mxu1 }
 0x194   : > { %894 = vst [vmem:[#allocation2 + $0x10] sm:$0xff] %v787_v18  ;;  %v1180_v24 = vadd.f32 %v1179_v21, %v1178_v14  ;;  %v1181_v25 = vpop.f32.mrb[18].mxu0  ;;  %v1231_v26 = vpop.f32.mrb[17].mxu1  ;;  %v770_v28 = vmul.f32 1.442695, %v755_v20  ;;  %v756_v33 = vmin.f32 %v730_v23, 0.0 }
 0x195   : > { %v788_v27 = vsel %vm743_vm7, %v1846_v34, %v1124_v19  ;;  %v1182_v29 = vpop.f32.mrb[19].mxu0  ;;  %v737_v31 = vpop.f32.mrb[18].mxu1  ;;  %v901_v36 = vld [vmem:[#allocation2] ss:$2 sm:$0xff]  ;;  %v909_v37 = vld [vmem:[#allocation2 + $0x1] ss:$2 sm:$0xff] }
 0x196   : > { %895 = vst [vmem:[#allocation2 + $0x18] sm:$0xff] %v788_v27  ;;  %v663_v30 = vadd.f32 %v1180_v24, %v1838_v2  ;;  %v1232_v35 = vpop.f32.mrb[19].mxu1  ;;  %1358 = vpow2.f32 %v770_v28  ;;  %v772_v39 = vmul.f32 1.442695, %v756_v33  ;;  %v924_v43 = vmax.f32 %v901_v36, %v909_v37 }
 0x197   : > { %vm747_vm11 = vcmp.gt.f32.partialorder %v730_v23, 0.0 }
 0x198   : > { %v1355_v38 = vpop.eup %1354  ;;  %v735_v40 = vadd.f32 %v734_v22, %v663_v30  ;;  %1360 = vpow2.f32 %v772_v39 }
 0x199   : > { %v1125_v41 = vadd.f32 -1.0, %v1355_v38 }
 0x19a   : > { %v1357_v42 = vpop.eup %1356  ;;  %v757_v34 = vmin.f32 %v735_v40, 0.0  ;;  %vm748_vm13 = vcmp.gt.f32.partialorder %v735_v40, 0.0 }
 0x19b   : > { %v789_v44 = vsel %vm744_vm8, %v1851_v51, %v1125_v41  ;;  %v1126_v45 = vadd.f32 -1.0, %v1357_v42  ;;  %v917_v46 = vld [vmem:[#allocation2 + $0x2] ss:$2 sm:$0xff] }
 0x19c   : > { %896 = vst [vmem:[#allocation2 + $0x20] sm:$0xff] %v789_v44  ;;  %v774_v2 = vmul.f32 1.442695, %v757_v34  ;;  %v928_v47 = vmax.f32 %v924_v43, %v917_v46 }
 0x19d   : > { %v790_v48 = vsel %vm745_vm9, %v1855_v56, %v1126_v45  ;;  %v903_v49 = vld [vmem:[#allocation2 + $0x10] ss:$2 sm:$0xff]  ;;  %v911_v50 = vld [vmem:[#allocation2 + $0x11] ss:$2 sm:$0xff] }
 0x19e   : > { %897 = vst [vmem:[#allocation2 + $0x28] sm:$0xff] %v790_v48  ;;  %1362 = vpow2.f32 %v774_v2  ;;  %932 = vst [vmem:[%s1869_s26] sm:$0xff] %v928_v47  ;;  %v925_v54 = vmax.f32 %v903_v49, %v911_v50 }
 0x1a0   : > { %v1359_v51 = vpop.eup %1358 }
 0x1a1   : > { %v1127_v53 = vadd.f32 -1.0, %v1359_v51 }
 0x1a2   : > { %v1361_v57 = vpop.eup %1360 }
 0x1a3   : > { %v919_v55 = vld [vmem:[#allocation2 + $0x12] ss:$2 sm:$0xff]  ;;  %v791_v58 = vsel %vm746_vm10, %v727_v15, %v1127_v53  ;;  %v1128_v59 = vadd.f32 -1.0, %v1361_v57 }
 0x1a4   : > { %v929_v56 = vmax.f32 %v925_v54, %v919_v55  ;;  %898 = vst [vmem:[#allocation2 + $0x30] sm:$0xff] %v791_v58 }
 0x1a5   : > { %v792_v61 = vsel %vm747_vm11, %v730_v23, %v1128_v59  ;;  %v905_v63 = vld [vmem:[#allocation2 + $0x20] ss:$2 sm:$0xff]  ;;  %v913_v32 = vld [vmem:[#allocation2 + $0x21] ss:$2 sm:$0xff] }
 0x1a6   : > { %933 = vst [vmem:[%s1869_s26 + $0x8] sm:$0xff] %v929_v56  ;;  %899 = vst [vmem:[#allocation2 + $0x38] sm:$0xff] %v792_v61  ;;  %v926_v4 = vmax.f32 %v905_v63, %v913_v32 }
 0x1a8   : > { %v1363_v62 = vpop.eup %1362 }
 0x1a9   : > { %v1129_v1 = vadd.f32 -1.0, %v1363_v62 }
 0x1ab   : > { %v793_v3 = vsel %vm748_vm13, %v735_v40, %v1129_v1  ;;  %v921_v6 = vld [vmem:[#allocation2 + $0x22] ss:$2 sm:$0xff] }
 0x1ac   : > { %v891_v5 = vsel %vm846_vm12, %v793_v3, -1e+30  ;;  %v930_v7 = vmax.f32 %v926_v4, %v921_v6 }
 0x1ad   : > { %900 = vst [vmem:[#allocation2 + $0x40] sm:$0xff] %v891_v5  ;;  %v907_v8 = vld [vmem:[#allocation2 + $0x30] ss:$2 sm:$0xff]  ;;  %v915_v9 = vld [vmem:[#allocation2 + $0x31] ss:$2 sm:$0xff] }
 0x1ae   : > { %934 = vst [vmem:[%s1869_s26 + $0x10] sm:$0xff] %v930_v7  ;;  %v927_v10 = vmax.f32 %v907_v8, %v915_v9 }
 0x1b4   : > { %v923_v11 = vld [vmem:[#allocation2 + $0x32] ss:$2 sm:$0xff] }
 0x1b5   : > { %v931_v0 = vmax.f32 %v927_v10, %v923_v11 }
 0x1b7   : > { %935 = vst [vmem:[%s1869_s26 + $0x18] sm:$0xff] %v931_v0 }
 0x1b8   : > { %1466 = shalt.err (!%p1463_p8)
}
 0x1b9   : > { %s1467_s12 = scalar_lea.hbm %s1880_s22, 512  ;;  %s1471_s25 = scalar_lea.hbm %s1936_s4, 1024 }
 0x1ba   : > { %p1468_p11 = scmp.ne.s32.totalorder %s1880_s22, %s1467_s12  ;;  %p1472_p6 = scmp.lt.u32.totalorder %s1880_s22, %s1936_s4 }
 0x1bb   : > { %p1473_p13 = scmp.lt.u32.totalorder %s1471_s25, %s1467_s12  ;;  %p1475_p5 = scmp.lt.u32.totalorder %s1467_s12, %s1880_s22 }
 0x1bc   : > { %p1469_p12 = pnand %p1468_p11, %p1675_p10 }
 0x1bd   : > { %p1474_p0 = por %p1473_p13, %p1472_p6 }
 0x1be   : > { %p1470_p3 = pneg %p1469_p12 }
 0x1bf   : > { %p1476_p9 = por %p1475_p5, %p1474_p0 }
 0x1c1   : > { %p1477_p1 = pnand %p1476_p9, %p1470_p3 }
 0x1c3   : > { %1480 = shalt.err (!%p1477_p1)
}
 0x1c4   : > { %s1553_s14 = smov 128   ;;  %s1554_s21 = smov 8  }
 0x1c5   : > { %1241 = dma.vmem_to_hbm [thread:$0]  (%p1675_p10), %s1882_s29, 512, %s1880_s22, %s937_s27, %s1553_s14, %s1553_s14, %s1554_s21  }
 0x1c6 PF: > { %s967_s23 = sand.u32 1, %s1523_s15   ;;  %p1966_p2 = scmp.ne.s32.totalorder %s1950_s24, 0 }
 0x1c7   : > { %p1967_p7 = scmp.ge.s32.totalorder %s1543_s20, 2  ;;  %s968_s26 = scalar_lea.sflag [#allocation5], %s967_s23 }
 0x1c9   : > { %p1255_p4 = pnand %p1967_p7, %p1966_p2 }
 0x1cb   : > { %1518 = dma.done.wait (!%p1255_p4), %s968_s26, 512  }
 0x1cc   : > { %1520 = vsyncadd (!%p1255_p4), %s968_s26, 4294966784  ;;  %s23_s20 = sadd.s32 1, %s1543_s20   ;;  %s1968_s18 = sld [smem:[#allocation14_spill]] }
 0x1cd   : > { %p20_p8 = scmp.ge.s32.totalorder %s23_s20, 4   ;;  %s1969_s19 = sld [smem:[#allocation15_spill]] }
 0x1ce   : > { %s1970_s15 = smov %s1527_s16  ;;  %s1971_s16 = smov %s1531_s17 }
 0x1cf   : > { %s1972_s17 = smov %s1687_s7  ;;  %22 = sbr.rel (!%p20_p8) target bundleno = 11 (0xb), region = 113 }
 0x1d6   :  { %973 = vsyncpa [#allocation4], 1 }
 0x1d7   :  { %975 = vsyncpa [#allocation4 + $0x1], 1 }
 0x1d8   :  { %976 = vsyncpa [#allocation7], 1 }
 0x1d9   :  { %978 = vsyncpa [#allocation7 + $0x1], 1 }
 0x1da   :  { %979 = vsyncpa [#allocation5], 1 }
 0x1db   :  { %981 = vsyncpa [#allocation5 + $0x1], 1 }

</bundles_post_ra>
